<compile_context>
chip_gen: v5e
topology: v5e:2x2
jax: 0.10.0
libtpu: 0.0.40
codegen_flags: <defaults>
</compile_context>

<pallas_src>
from functools import partial

import jax
import jax.numpy as jnp
from jax.experimental import pallas as pl
from jax.experimental.pallas import tpu as pltpu  # noqa: F401  (TPU backend import)

EMBEDDING_SIZE = 384      # dinov2_s
NUM_CLASSES = 5
NUM_SUBCLASSES = 3
BATCH = 8


def _fused_heads_kernel(x_ref, w_ref, b_ref, out_ref):
    """Single fused dual-head linear kernel.

    x:   [B, E]  float32  (backbone features; cast to bf16 on the VPU)
    w:   [E, N]  bfloat16 (pre-transposed, pre-fused [W_cls; W_sub].T)
    b:   [1, N]  float32  (pre-fused [b_cls; b_sub])
    out: [B, N]  float32  (columns [:C] = class logits, [C:] = subclass logits)
    """
    x = x_ref[...].astype(jnp.bfloat16)
    acc = jnp.dot(x, w_ref[...], preferred_element_type=jnp.float32)
    out_ref[...] = acc + b_ref[...]


def fuse_head_params(w_cls, b_cls, w_sub, b_sub):
    """One-time parameter fusion (do this at init, NOT per inference call).

    Takes nn.Linear-layout weights ([out, in]) and returns:
      w_fused: [E, C+S] bfloat16  (transposed so the kernel does a plain x @ w)
      b_fused: [1, C+S] float32
    """
    w_fused = jnp.concatenate([w_cls, w_sub], axis=0).T.astype(jnp.bfloat16)
    b_fused = jnp.concatenate([b_cls, b_sub], axis=0).reshape(1, -1).astype(jnp.float32)
    return w_fused, b_fused


@partial(jax.jit, static_argnames=("num_classes",))
def classifier_heads(x, w_fused, b_fused, *, num_classes):
    """Fused class-head / subclass-head forward.

    Equivalent (up to bf16 matmul rounding) to:
        class_output    = x @ w_cls.T + b_cls
        subclass_output = x @ w_sub.T + b_sub
    with w_fused/b_fused produced once by `fuse_head_params`.
    """
    B, E = x.shape
    N = w_fused.shape[1]

    full = lambda shape: pl.BlockSpec(shape, lambda: tuple(0 for _ in shape))

    out = pl.pallas_call(
        _fused_heads_kernel,
        grid=(),
        in_specs=[
            full((B, E)),   # features, f32
            full((E, N)),   # fused weights, bf16
            full((1, N)),   # fused bias, f32
        ],
        out_specs=full((B, N)),
        out_shape=jax.ShapeDtypeStruct((B, N), jnp.float32),
        cost_estimate=pl.CostEstimate(
            flops=2 * B * E * N,
            bytes_accessed=4 * B * E + 2 * E * N + 4 * N + 4 * B * N,
            transcendentals=0,
        ),
    )(x, w_fused, b_fused)

    # Split the combined logits (fused into the same jit program; cheap slices).
    return out[:, :num_classes], out[:, num_classes:]


def _init_params(key):
    """Deterministic synthetic parameters matching nn.Linear ([out, in]) shapes."""
    k1, k2, k3, k4 = jax.random.split(key, 4)
    bound = 1.0 / (EMBEDDING_SIZE ** 0.5)
    w_cls = jax.random.uniform(k1, (NUM_CLASSES, EMBEDDING_SIZE),
                               jnp.float32, -bound, bound)
    b_cls = jax.random.uniform(k2, (NUM_CLASSES,), jnp.float32, -bound, bound)
    w_sub = jax.random.uniform(k3, (NUM_SUBCLASSES, EMBEDDING_SIZE),
                               jnp.float32, -bound, bound)
    b_sub = jax.random.uniform(k4, (NUM_SUBCLASSES,), jnp.float32, -bound, bound)
    return w_cls, b_cls, w_sub, b_sub


if __name__ == "__main__":
    key = jax.random.PRNGKey(0)
    k_x, k_p = jax.random.split(key)

    # Backbone features (stand-in for DINOv2 output): [B, 384]
    x = jax.random.normal(k_x, (BATCH, EMBEDDING_SIZE), jnp.float32)
    w_cls, b_cls, w_sub, b_sub = _init_params(k_p)

    # One-time parameter fusion (hoisted out of the per-call path).
    w_fused, b_fused = fuse_head_params(w_cls, b_cls, w_sub, b_sub)

    cls_out, sub_out = classifier_heads(x, w_fused, b_fused,
                                        num_classes=NUM_CLASSES)
    jax.block_until_ready((cls_out, sub_out))

    # Reference check in plain JAX (same semantics as the two nn.Linear heads).
    ref_cls = x @ w_cls.T + b_cls
    ref_sub = x @ w_sub.T + b_sub
    assert cls_out.shape == (BATCH, NUM_CLASSES)
    assert sub_out.shape == (BATCH, NUM_SUBCLASSES)
    # bf16 matmul inputs -> relaxed tolerance; argmax (what classification uses)
    # must still match exactly.
    assert jnp.allclose(cls_out, ref_cls, atol=2e-2, rtol=2e-2)
    assert jnp.allclose(sub_out, ref_sub, atol=2e-2, rtol=2e-2)
    assert jnp.array_equal(jnp.argmax(cls_out, -1), jnp.argmax(ref_cls, -1))
    assert jnp.array_equal(jnp.argmax(sub_out, -1), jnp.argmax(ref_sub, -1))

    print("KERNEL_OK")
</pallas_src>

<mosaic_0001>
module attributes {stable_mosaic.version = 11 : i64} {
  func.func @_fused_heads_kernel(%arg0: memref<8x384xf32, #tpu.memory_space<vmem>>, %arg1: memref<384x8xbf16, #tpu.memory_space<vmem>>, %arg2: memref<1x8xf32, #tpu.memory_space<vmem>>, %arg3: memref<8x8xf32, #tpu.memory_space<vmem>>) attributes {dimension_semantics = [], scalar_prefetch = 0 : i64, scratch_operands = 0 : i64, tpu.core_type = #tpu.core_type<tc>} {
    %c0 = arith.constant 0 : index
    %c0_0 = arith.constant 0 : index
    %0 = vector.load %arg0[%c0, %c0_0] : memref<8x384xf32, #tpu.memory_space<vmem>>, vector<8x384xf32>
    %1 = arith.truncf %0 : vector<8x384xf32> to vector<8x384xbf16>
    %c0_1 = arith.constant 0 : index
    %c0_2 = arith.constant 0 : index
    %2 = vector.load %arg1[%c0_1, %c0_2] : memref<384x8xbf16, #tpu.memory_space<vmem>>, vector<384x8xbf16>
    %cst = arith.constant dense<0.000000e+00> : vector<8x8xf32>
    %3 = tpu.matmul %1, %2, %cst {dimension_numbers = #tpu.dot_dimension_numbers<[1], [0], [0], [1], [0, 0, 1, 1], [], []>} : vector<8x384xbf16>, vector<384x8xbf16>, vector<8x8xf32> -> vector<8x8xf32>
    %c0_3 = arith.constant 0 : index
    %c0_4 = arith.constant 0 : index
    %4 = vector.load %arg2[%c0_3, %c0_4] : memref<1x8xf32, #tpu.memory_space<vmem>>, vector<1x8xf32>
    %5 = vector.broadcast %4 : vector<1x8xf32> to vector<8x8xf32>
    %6 = arith.addf %3, %5 : vector<8x8xf32>
    %c0_5 = arith.constant 0 : index
    %c0_6 = arith.constant 0 : index
    %7 = vector.load %arg3[%c0_5, %c0_6] : memref<8x8xf32, #tpu.memory_space<vmem>>, vector<8x8xf32>
    tpu.vector_store %arg3[%c0_5, %c0_6], %6 {strides = array<i32>} : memref<8x8xf32, #tpu.memory_space<vmem>>, vector<8x8xf32>,
    return
  }
}

</mosaic_0001>

<bundles_post_ra>
// kernel: classifier_heads.1
= control target key start
LH: loop header
LB: loop body
LE: loop exit
PB: predicated region body
PF: predicated region fallthrough
CT: control target
= control target key end

     0   :  { %vm255_vm0 = vcmask 64512   ;;  %s489_s1 = inlined_call_operand.vmem [shape: bf16[384,8], index: 1, kind: input, shape index: {}]   ;;  %s490_s2 = inlined_call_operand.vmem [shape: f32[1,8], index: 2, kind: input, shape index: {}]   ;;  %s491_s0 = inlined_call_operand.vmem [shape: f32[8,384], index: 0, kind: input, shape index: {}]   ;;  %s492_s3 = inlined_call_operand.vmem [shape: f32[8,8], index: 3, kind: output, shape index: {}]  }
   0x1   :  { %v364_v0 = vld [vmem:[%s489_s1 + $0x38] sm:$0xff]  ;;  %v363_v3 = vld [vmem:[%s489_s1 + $0x30] sm:$0xff]  ;;  %v362_v6 = vld [vmem:[%s489_s1 + $0x28] sm:$0xff] }
   0x2   :  { %v372_v1 = vld [vmem:[%s489_s1 + $0x78] sm:$0xff]  ;;  %216 = vmatpush.bf16.msra.mxu0 %v364_v0  ;;  %v371_v4 = vld [vmem:[%s489_s1 + $0x70] sm:$0xff]  ;;  %v370_v7 = vld [vmem:[%s489_s1 + $0x68] sm:$0xff] }
   0x3   :  { %v380_v2 = vld [vmem:[%s489_s1 + $0xb8] sm:$0xff]  ;;  %229 = vmatpush.bf16.msra.mxu1 %v372_v1  ;;  %v379_v5 = vld [vmem:[%s489_s1 + $0xb0] sm:$0xff]  ;;  %v378_v8 = vld [vmem:[%s489_s1 + $0xa8] sm:$0xff] }
   0x4   :  { %242 = vmatpush.bf16.msra.mxu2 %v380_v2  ;;  %v361_v9 = vld [vmem:[%s489_s1 + $0x20] sm:$0xff]  ;;  %v360_v12 = vld [vmem:[%s489_s1 + $0x18] sm:$0xff]  ;;  %v359_v15 = vld [vmem:[%s489_s1 + $0x10] sm:$0xff] }
   0x5   :  { %v369_v10 = vld [vmem:[%s489_s1 + $0x60] sm:$0xff]  ;;  %v368_v13 = vld [vmem:[%s489_s1 + $0x58] sm:$0xff]  ;;  %v367_v16 = vld [vmem:[%s489_s1 + $0x50] sm:$0xff] }
   0x6   :  { %217 = vmatpush.bf16.msra.mxu0 %v363_v3  ;;  %v377_v11 = vld [vmem:[%s489_s1 + $0xa0] sm:$0xff]  ;;  %v376_v14 = vld [vmem:[%s489_s1 + $0x98] sm:$0xff]  ;;  %v375_v17 = vld [vmem:[%s489_s1 + $0x90] sm:$0xff] }
   0x7   :  { %230 = vmatpush.bf16.msra.mxu1 %v371_v4  ;;  %v358_v18 = vld [vmem:[%s489_s1 + $0x8] sm:$0xff]  ;;  %v357_v21 = vld [vmem:[%s489_s1] sm:$0xff]  ;;  %v16_v26 = vld [vmem:[%s491_s0 + $0x10] sm:$0xff] }
   0x8   :  { %243 = vmatpush.bf16.msra.mxu2 %v379_v5  ;;  %v366_v19 = vld [vmem:[%s489_s1 + $0x48] sm:$0xff]  ;;  %v365_v22 = vld [vmem:[%s489_s1 + $0x40] sm:$0xff]  ;;  %v19_v29 = vpack.c.bf16 %v16_v26, %v16_v26 }
   0x9   :  { %v374_v20 = vld [vmem:[%s489_s1 + $0x88] sm:$0xff]  ;;  %v14_v23 = vld [vmem:[%s491_s0] sm:$0xff] }
   0xa   :  { %218 = vmatpush.bf16.msra.mxu0 %v362_v6  ;;  %v15_v24 = vld [vmem:[%s491_s0 + $0x8] sm:$0xff]  ;;  %v373_v25 = vld [vmem:[%s489_s1 + $0x80] sm:$0xff]  ;;  %v17_v27 = vpack.c.bf16 %v14_v23, %v14_v23 }
   0xb   :  { %231 = vmatpush.bf16.msra.mxu1 %v370_v7  ;;  %v18_v28 = vpack.c.bf16 %v15_v24, %v15_v24  ;;  %v381_v30 = vld [vmem:[%s490_s2] ss:$0 sm:$0xff] }
   0xc   :  { %244 = vmatpush.bf16.msra.mxu2 %v378_v8 }
   0xe   :  { %219 = vmatpush.bf16.msra.mxu0 %v361_v9 }
   0xf   :  { %232 = vmatpush.bf16.msra.mxu1 %v369_v10 }
  0x10   :  { %245 = vmatpush.bf16.msra.mxu2 %v377_v11 }
  0x12   :  { %220 = vmatpush.bf16.msra.mxu0 %v360_v12 }
  0x13   :  { %233 = vmatpush.bf16.msra.mxu1 %v368_v13 }
  0x14   :  { %246 = vmatpush.bf16.msra.mxu2 %v376_v14 }
  0x16   :  { %221 = vmatpush.bf16.msra.mxu0 %v359_v15 }
  0x17   :  { %234 = vmatpush.bf16.msra.mxu1 %v367_v16 }
  0x18   :  { %247 = vmatpush.bf16.msra.mxu2 %v375_v17 }
  0x1a   :  { %222 = vmatpush.bf16.msra.mxu0 %v358_v18 }
  0x1b   :  { %235 = vmatpush.bf16.msra.mxu1 %v366_v19 }
  0x1c   :  { %248 = vmatpush.bf16.msra.mxu2 %v374_v20 }
  0x1e   :  { %223 = vmatpush.bf16.msra.mxu0 %v357_v21 }
  0x1f   :  { %236 = vmatpush.bf16.msra.mxu1 %v365_v22 }
  0x20   :  { %249 = vmatpush.bf16.msra.mxu2 %v373_v25 }
  0x21   :  { %224 = vmatmul.bf16.vlgmr.msra.gmra.mxu0 %v17_v27 }
  0x22   :  { %237 = vmatmul.bf16.vlgmr.msra.gmra.mxu1 %v18_v28 }
  0x23   :  { %250 = vmatmul.bf16.vlgmr.msra.gmra.mxu2 %v19_v29 }
  0x9e   :  { %v225_v31 = vpop.f32.mrf.mxu0 }
  0x9f   :  { %v238_v32 = vpop.f32.mrf.mxu1  ;;  %v226_v33 = vadd.f32 %v381_v30, %v225_v31 }
  0xa1   :  { %v239_v34 = vadd.f32 %v238_v32, %v226_v33 }
  0xa6   :  { %v251_v35 = vpop.f32.mrf.mxu2  ;;  %v227_v37 = vpop.f32.mrf.mxu0 }
  0xa7   :  { %v252_v36 = vadd.f32 %v251_v35, %v239_v34  ;;  %v240_v38 = vpop.f32.mrf.mxu1 }
  0xa9   :  { %256 = vst.msk [vmem:[%s492_s3] sm:$0xff] %vm255_vm0, %v252_v36 }
  0xae   :  { %v253_v39 = vpop.f32.mrf.mxu2 }

</bundles_post_ra>
